<compile_context>
chip_gen: v7x
topology: tpu7x:2x2x1
jax: 0.10.0
libtpu: 0.0.40
codegen_flags: <defaults>
</compile_context>

<pallas_src>
import functools
import math

import jax
import jax.numpy as jnp
from jax.experimental import pallas as pl
from jax.experimental.pallas import tpu as pltpu

LANE = 128
EPS = 1e-5
EXPANSION = 4                      # BagNet Bottleneck expansion
VMEM_LIMIT = 32 * 1024 * 1024      # explicit, safe on v5e/v6e/v7x


def _round_up(x, m):
    return (x + m - 1) // m * m


def _cp(c):
    """Channel count padded to a lane multiple."""
    return max(_round_up(c, LANE), LANE)


# ----------------------------------------------------------------------------
# Pallas kernels
# ----------------------------------------------------------------------------
def _matmul_kernel(x_ref, w_ref, s_ref, b_ref, o_ref, *, relu):
    y = jnp.dot(x_ref[...], w_ref[...], preferred_element_type=jnp.float32)
    y = y * s_ref[...] + b_ref[...]
    if relu:
        y = jnp.maximum(y, 0.0)
    o_ref[...] = y.astype(o_ref.dtype)


def _matmul_res_kernel(x_ref, w_ref, s_ref, b_ref, r_ref, o_ref, *, relu):
    y = jnp.dot(x_ref[...], w_ref[...], preferred_element_type=jnp.float32)
    y = y * s_ref[...] + b_ref[...] + r_ref[...].astype(jnp.float32)
    if relu:
        y = jnp.maximum(y, 0.0)
    o_ref[...] = y.astype(o_ref.dtype)


def _conv3x3_kernel(x_ref, w_ref, s_ref, b_ref, o_ref, acc_ref,
                    *, kh, kw, wo, cp, starts, relu):
    """Per-output-row conv kernel; grid axis 3 reduces over the kh row taps."""
    dy = pl.program_id(3)

    @pl.when(dy == 0)
    def _init():
        acc_ref[...] = jnp.zeros_like(acc_ref)

    acc = acc_ref[...]
    for dx in range(kw):                     # static loop over column taps
        lhs = x_ref[0, 0, pl.ds(starts[dx], wo), :]          # (wo, cp) bf16
        rhs = w_ref[0, pl.ds(dx * cp, cp), :]                # (cp, TC) bf16
        acc = acc + jnp.dot(lhs, rhs, preferred_element_type=jnp.float32)
    acc_ref[...] = acc

    @pl.when(dy == kh - 1)
    def _finalize():
        y = acc_ref[...] * s_ref[...] + b_ref[...]
        if relu:
            y = jnp.maximum(y, 0.0)
        o_ref[0, 0, :, :] = y.astype(o_ref.dtype)


def _avgpool_kernel(x_ref, o_ref, *, inv_hw):
    s = jnp.sum(x_ref[0, :, :].astype(jnp.float32), axis=0, keepdims=True)
    o_ref[0, :, :] = s * inv_hw


# ----------------------------------------------------------------------------
# Kernel wrappers
# ----------------------------------------------------------------------------
def fused_matmul(x, w, scale, bias, residual=None, relu=False,
                 out_dtype=jnp.bfloat16):
    """y = relu?(x @ w * scale + bias (+ residual)).

    x: (M, K) -> bf16.  w: (K, Np) bf16, Np % 128 == 0 (pre-packed).
    scale/bias: (1, Np) f32.  residual: (M, Np) bf16 or None.
    """
    M, K = x.shape
    K2, Np = w.shape
    assert K == K2 and K % LANE == 0 and Np % LANE == 0
    x = x.astype(jnp.bfloat16)

    TN = 256 if Np % 256 == 0 else LANE
    TM = min(256, _round_up(M, 16))
    gm = pl.cdiv(M, TM)
    gn = Np // TN

    in_specs = [
        pl.BlockSpec((TM, K), lambda i, j: (i, 0)),
        pl.BlockSpec((K, TN), lambda i, j: (0, j)),
        pl.BlockSpec((1, TN), lambda i, j: (0, j)),
        pl.BlockSpec((1, TN), lambda i, j: (0, j)),
    ]
    args = [x, w, scale, bias]
    nbytes = 2 * (M * K + K * Np) + 8 * Np + M * Np * jnp.dtype(out_dtype).itemsize
    if residual is not None:
        in_specs.append(pl.BlockSpec((TM, TN), lambda i, j: (i, j)))
        args.append(residual.astype(jnp.bfloat16))
        nbytes += 2 * M * Np
        kernel = functools.partial(_matmul_res_kernel, relu=relu)
    else:
        kernel = functools.partial(_matmul_kernel, relu=relu)

    return pl.pallas_call(
        kernel,
        out_shape=jax.ShapeDtypeStruct((M, Np), out_dtype),
        grid=(gm, gn),
        in_specs=in_specs,
        out_specs=pl.BlockSpec((TM, TN), lambda i, j: (i, j)),
        compiler_params=pltpu.CompilerParams(
            dimension_semantics=("parallel", "parallel"),
            vmem_limit_bytes=VMEM_LIMIT),
        cost_estimate=pl.CostEstimate(
            flops=int(2 * M * K * Np), transcendentals=0,
            bytes_accessed=int(nbytes)),
    )(*args)


def conv1x1(x, pk, stride=1, relu=False, residual=None, out_hw=None):
    """1x1 conv + BN (+ residual) (+ ReLU).  x: (N,H,W,Cp) bf16 channel-padded."""
    N, H, W, Cp = x.shape
    if out_hw is not None:
        Ho, Wo = out_hw
    else:
        Ho = (H - 1) // stride + 1
        Wo = (W - 1) // stride + 1
    if stride != 1 or (Ho, Wo) != (H, W):
        x = x[:, :(Ho - 1) * stride + 1:stride, :(Wo - 1) * stride + 1:stride, :]
    M = N * Ho * Wo
    coutp = pk["w"].shape[1]
    rm = residual.reshape(M, coutp) if residual is not None else None
    y = fused_matmul(x.reshape(M, Cp), pk["w"], pk["scale"], pk["bias"],
                     residual=rm, relu=relu, out_dtype=jnp.bfloat16)
    return y.reshape(N, Ho, Wo, coutp)


def conv3x3(x, pk, stride=1, relu=True):
    """kxk (k=3) valid conv + BN (+ ReLU) without HBM im2col."""
    N, H, W, Cp = x.shape
    kh, kw = pk["kh"], pk["kw"]
    Ho = (H - kh) // stride + 1
    Wo = (W - kw) // stride + 1
    coutp = pk["w"].shape[-1]

    if stride == 1:
        xin = x
        wcols = W
        starts = tuple(range(kw))
    else:
        # Pre-stride along W only (<= kw/stride-fold blowup, not kh*kw-fold).
        xin = jnp.concatenate(
            [x[:, :, dx:dx + (Wo - 1) * stride + 1:stride, :] for dx in range(kw)],
            axis=2)
        wcols = kw * Wo
        starts = tuple(dx * Wo for dx in range(kw))

    TC = 256 if coutp % 256 == 0 else LANE
    nj = coutp // TC
    kernel = functools.partial(_conv3x3_kernel, kh=kh, kw=kw, wo=Wo, cp=Cp,
                               starts=starts, relu=relu)
    flops = 2 * N * Ho * Wo * kh * kw * Cp * coutp
    nbytes = 2 * (N * Ho * kh * wcols * Cp + N * Ho * Wo * coutp
                  + kh * kw * Cp * coutp)

    return pl.pallas_call(
        kernel,
        out_shape=jax.ShapeDtypeStruct((N, Ho, Wo, coutp), jnp.bfloat16),
        grid=(N, Ho, nj, kh),
        in_specs=[
            pl.BlockSpec((1, 1, wcols, Cp),
                         lambda n, ho, j, dy: (n, ho * stride + dy, 0, 0)),
            pl.BlockSpec((1, kw * Cp, TC), lambda n, ho, j, dy: (dy, 0, j)),
            pl.BlockSpec((1, TC), lambda n, ho, j, dy: (0, j)),
            pl.BlockSpec((1, TC), lambda n, ho, j, dy: (0, j)),
        ],
        out_specs=pl.BlockSpec((1, 1, Wo, TC),
                               lambda n, ho, j, dy: (n, ho, 0, j)),
        scratch_shapes=[pltpu.VMEM((Wo, TC), jnp.float32)],
        compiler_params=pltpu.CompilerParams(
            dimension_semantics=("parallel", "parallel", "parallel", "arbitrary"),
            vmem_limit_bytes=VMEM_LIMIT),
        cost_estimate=pl.CostEstimate(
            flops=int(flops), transcendentals=0, bytes_accessed=int(nbytes)),
    )(xin, pk["w"], pk["scale"], pk["bias"])


def conv_apply(x, pk, stride=1, relu=False, residual=None, out_hw=None):
    if pk["kh"] == 1:
        return conv1x1(x, pk, stride=stride, relu=relu,
                       residual=residual, out_hw=out_hw)
    # BagNet only adds the residual on the (1x1) conv3 path.
    return conv3x3(x, pk, stride=stride, relu=relu)


def global_avg_pool(x):
    """x: (N, H, W, Cp) bf16 -> (N, Cp) f32, blocked over batch."""
    N, H, W, C = x.shape
    xr = x.reshape(N, H * W, C)
    out = pl.pallas_call(
        functools.partial(_avgpool_kernel, inv_hw=1.0 / float(H * W)),
        out_shape=jax.ShapeDtypeStruct((N, 1, C), jnp.float32),
        grid=(N,),
        in_specs=[pl.BlockSpec((1, H * W, C), lambda n: (n, 0, 0))],
        out_specs=pl.BlockSpec((1, 1, C), lambda n: (n, 0, 0)),
        compiler_params=pltpu.CompilerParams(
            dimension_semantics=("parallel",),
            vmem_limit_bytes=VMEM_LIMIT),
    )(xr)
    return out.reshape(N, C)


# ----------------------------------------------------------------------------
# Parameters: deterministic synthetic weights, packed ONCE for the kernels
# ----------------------------------------------------------------------------
def _conv_weight(key, cout, cin, k):
    n = k * k * cout
    return math.sqrt(2.0 / n) * jax.random.normal(key, (cout, cin, k, k), jnp.float32)


def _bn_affine(c):
    gamma = jnp.ones((c,), jnp.float32)
    beta = jnp.zeros((c,), jnp.float32)
    mean = jnp.zeros((c,), jnp.float32)
    var = jnp.ones((c,), jnp.float32)
    scale = gamma / jnp.sqrt(var + EPS)
    bias = beta - mean * scale
    return scale, bias


def _pack_conv(w, bn, cin_p):
    """Pack a PyTorch-layout (Cout,Cin,kh,kw) conv + folded BN for the kernels."""
    cout, cin, kh, kw = w.shape
    coutp = _cp(cout)
    scale, bias = bn
    s = jnp.zeros((1, coutp), jnp.float32).at[0, :cout].set(scale)
    b = jnp.zeros((1, coutp), jnp.float32).at[0, :cout].set(bias)
    if kh == 1 and kw == 1:
        wp = jnp.zeros((cin_p, coutp), jnp.float32)
        wp = wp.at[:cin, :cout].set(w.reshape(cout, cin).T)
        return {"kh": 1, "kw": 1, "w": wp.astype(jnp.bfloat16),
                "scale": s, "bias": b}
    wt = jnp.transpose(w, (2, 3, 1, 0))                      # (kh, kw, cin, cout)
    wp = jnp.zeros((kh, kw * cin_p, coutp), jnp.float32)
    for dy in range(kh):
        for dx in range(kw):
            wp = wp.at[dy, dx * cin_p:dx * cin_p + cin, :cout].set(wt[dy, dx])
    return {"kh": kh, "kw": kw, "w": wp.astype(jnp.bfloat16),
            "scale": s, "bias": b}


def make_bagnet_params(key, layers, strides, kernel3, num_classes):
    keys = iter(jax.random.split(key, 256))
    params = {"num_classes": num_classes}

    w_conv1 = _conv_weight(next(keys), 64, 3, 1)
    w_conv2 = _conv_weight(next(keys), 64, 64, 3)
    # conv1 (1x1) and conv2 (3x3) are both linear with no nonlinearity between:
    # fuse them into one 3x3 conv from the raw input.
    w_stem = jnp.einsum("ocyx,ci->oiyx", w_conv2, w_conv1[:, :, 0, 0])
    params["stem"] = _pack_conv(w_stem, _bn_affine(64), _cp(3))

    inplanes = 64
    for li, (planes, blocks, stride, k3) in enumerate(
            zip([64, 128, 256, 512], layers, strides, kernel3), start=1):
        blk_list = []
        for bi in range(blocks):
            s = stride if bi == 0 else 1
            kernel = 3 if k3 > bi else 1      # matches _make_layer kernel choice
            blk = {
                "conv1": _pack_conv(_conv_weight(next(keys), planes, inplanes, 1),
                                    _bn_affine(planes), _cp(inplanes)),
                "conv2": _pack_conv(_conv_weight(next(keys), planes, planes, kernel),
                                    _bn_affine(planes), _cp(planes)),
                "conv3": _pack_conv(_conv_weight(next(keys), planes * EXPANSION, planes, 1),
                                    _bn_affine(planes * EXPANSION), _cp(planes)),
                "stride": s,
                "downsample": None,
            }
            if bi == 0 and (stride != 1 or inplanes != planes * EXPANSION):
                blk["downsample"] = _pack_conv(
                    _conv_weight(next(keys), planes * EXPANSION, inplanes, 1),
                    _bn_affine(planes * EXPANSION), _cp(inplanes))
            blk_list.append(blk)
            inplanes = planes * EXPANSION
        params[f"layer{li}"] = blk_list

    fin = 512 * EXPANSION
    bound = 1.0 / math.sqrt(fin)
    fc_w = jax.random.uniform(next(keys), (num_classes, fin), jnp.float32, -bound, bound)
    fc_b = jax.random.uniform(next(keys), (num_classes,), jnp.float32, -bound, bound)
    ncp = _cp(num_classes)
    params["fc"] = {
        "w": jnp.zeros((fin, ncp), jnp.float32).at[:, :num_classes]
                .set(fc_w.T).astype(jnp.bfloat16),
        "scale": jnp.zeros((1, ncp), jnp.float32).at[0, :num_classes].set(1.0),
        "bias": jnp.zeros((1, ncp), jnp.float32).at[0, :num_classes].set(fc_b),
    }
    return params


# ----------------------------------------------------------------------------
# Forward pass
# ----------------------------------------------------------------------------
def bottleneck_forward(x, blk):
    out = conv_apply(x, blk["conv1"], stride=1, relu=True)
    out = conv_apply(out, blk["conv2"], stride=blk["stride"], relu=True)
    _, Ho, Wo, _ = out.shape

    if blk["downsample"] is not None:
        # Compute the downsample directly at the cropped output size
        # (equivalent to PyTorch's conv-then-crop of the trailing rows/cols).
        residual = conv_apply(x, blk["downsample"], stride=blk["stride"],
                              relu=False, out_hw=(Ho, Wo))
    else:
        residual = x[:, :Ho, :Wo, :]

    # conv3 + bn3 + residual-add + relu, fused in one kernel epilogue.
    out = conv_apply(out, blk["conv3"], stride=1, relu=True, residual=residual)
    return out


def bagnet_forward(params, x_nchw, avg_pool=True):
    num_classes = params["num_classes"]
    x = jnp.transpose(x_nchw, (0, 2, 3, 1))                  # NCHW -> NHWC
    N, H, W, C = x.shape
    cin_p = _cp(C)
    xpad = jnp.zeros((N, H, W, cin_p), jnp.bfloat16)
    xpad = xpad.at[..., :C].set(x.astype(jnp.bfloat16))

    # stem: (conv1 o conv2) fused 3x3 + bn1 + relu
    x = conv3x3(xpad, params["stem"], stride=1, relu=True)

    for li in range(1, 5):
        for blk in params[f"layer{li}"]:
            x = bottleneck_forward(x, blk)

    if avg_pool:
        pooled = global_avg_pool(x)                          # (N, 512*expansion) f32
        logits = fused_matmul(pooled.astype(jnp.bfloat16), params["fc"]["w"],
                              params["fc"]["scale"], params["fc"]["bias"],
                              relu=False, out_dtype=jnp.float32)
        return logits[:, :num_classes]
    else:
        Nn, Hh, Ww, Cc = x.shape
        y = fused_matmul(x.reshape(Nn * Hh * Ww, Cc), params["fc"]["w"],
                         params["fc"]["scale"], params["fc"]["bias"],
                         relu=False, out_dtype=jnp.float32)
        return y.reshape(Nn, Hh, Ww, -1)[..., :num_classes]


if __name__ == "__main__":
    key = jax.random.PRNGKey(0)
    kp, kx = jax.random.split(key)

    # Small BagNet config: one Bottleneck per stage, 3x3 convs in stages 1-2.
    layers = [1, 1, 1, 1]
    strides = [1, 2, 2, 2]
    kernel3 = [1, 1, 0, 0]
    num_classes = 16

    params = make_bagnet_params(kp, layers, strides, kernel3, num_classes)
    x = jax.random.normal(kx, (2, 3, 16, 16), jnp.float32)   # NCHW input, like PyTorch

    out = bagnet_forward(params, x, avg_pool=True)
    out = jax.block_until_ready(out)
    assert out.shape == (2, num_classes), out.shape
    assert bool(jnp.all(jnp.isfinite(out)))
    print("KERNEL_OK")
</pallas_src>

<mosaic_0001>
module attributes {stable_mosaic.version = 11 : i64} {
  func.func @_conv3x3_kernel(%arg0: i32, %arg1: i32, %arg2: i32, %arg3: i32, %arg4: memref<1x1x16x128xbf16, #tpu.memory_space<vmem>>, %arg5: memref<1x384x128xbf16, #tpu.memory_space<vmem>>, %arg6: memref<1x128xf32, #tpu.memory_space<vmem>>, %arg7: memref<1x128xf32, #tpu.memory_space<vmem>>, %arg8: memref<1x1x14x128xbf16, #tpu.memory_space<vmem>>, %arg9: memref<14x128xf32, #tpu.memory_space<vmem>>) attributes {dimension_semantics = [#tpu.dimension_semantics<parallel>, #tpu.dimension_semantics<parallel>, #tpu.dimension_semantics<parallel>, #tpu.dimension_semantics<arbitrary>], iteration_bounds = array<i64: 2, 14, 1, 3>, scalar_prefetch = 0 : i64, scratch_operands = 1 : i64, tpu.core_type = #tpu.core_type<tc>, window_params = [{transform_indices = @transform_0, window_bounds = array<i64: 1, 1, 16, 128>}, {transform_indices = @transform_1, window_bounds = array<i64: 1, 384, 128>}, {transform_indices = @transform_2, window_bounds = array<i64: 1, 128>}, {transform_indices = @transform_3, window_bounds = array<i64: 1, 128>}, {transform_indices = @transform_4, window_bounds = array<i64: 1, 1, 14, 128>}]} {
    %c0_i32 = arith.constant 0 : i32
    %0 = arith.cmpi eq, %arg3, %c0_i32 : i32
    %1 = arith.extui %0 : i1 to i32
    %c0_i32_0 = arith.constant 0 : i32
    %2 = arith.cmpi ne, %1, %c0_i32_0 : i32
    scf.if %2 {
      %cst_24 = arith.constant 0.000000e+00 : f32
      %26 = vector.broadcast %cst_24 : f32 to vector<14x128xf32>
      %c0_25 = arith.constant 0 : index
      %c0_26 = arith.constant 0 : index
      %27 = vector.load %arg9[%c0_25, %c0_26] : memref<14x128xf32, #tpu.memory_space<vmem>>, vector<14x128xf32>
      tpu.vector_store %arg9[%c0_25, %c0_26], %26 {strides = array<i32>} : memref<14x128xf32, #tpu.memory_space<vmem>>, vector<14x128xf32>,
    } else {
    }
    %c0 = arith.constant 0 : index
    %c0_1 = arith.constant 0 : index
    %3 = vector.load %arg9[%c0, %c0_1] : memref<14x128xf32, #tpu.memory_space<vmem>>, vector<14x128xf32>
    %c0_2 = arith.constant 0 : index
    %c0_3 = arith.constant 0 : index
    %c0_4 = arith.constant 0 : index
    %c0_5 = arith.constant 0 : index
    %4 = vector.load %arg4[%c0_2, %c0_3, %c0_4, %c0_5] : memref<1x1x16x128xbf16, #tpu.memory_space<vmem>>, vector<1x1x14x128xbf16>
    %5 = vector.shape_cast %4 : vector<1x1x14x128xbf16> to vector<14x128xbf16>
    %c0_6 = arith.constant 0 : index
    %c0_7 = arith.constant 0 : index
    %c0_8 = arith.constant 0 : index
    %6 = vector.load %arg5[%c0_6, %c0_7, %c0_8] : memref<1x384x128xbf16, #tpu.memory_space<vmem>>, vector<1x128x128xbf16>
    %7 = vector.shape_cast %6 : vector<1x128x128xbf16> to vector<128x128xbf16>
    %cst = arith.constant dense<0.000000e+00> : vector<14x128xf32>
    %8 = tpu.matmul %5, %7, %cst {dimension_numbers = #tpu.dot_dimension_numbers<[1], [0], [0], [1], [0, 0, 1, 1], [], []>} : vector<14x128xbf16>, vector<128x128xbf16>, vector<14x128xf32> -> vector<14x128xf32>
    %9 = arith.addf %3, %8 : vector<14x128xf32>
    %c0_9 = arith.constant 0 : index
    %c0_10 = arith.constant 0 : index
    %c1 = arith.constant 1 : index
    %c0_11 = arith.constant 0 : index
    %10 = vector.load %arg4[%c0_9, %c0_10, %c1, %c0_11] : memref<1x1x16x128xbf16, #tpu.memory_space<vmem>>, vector<1x1x14x128xbf16>
    %11 = vector.shape_cast %10 : vector<1x1x14x128xbf16> to vector<14x128xbf16>
    %c0_12 = arith.constant 0 : index
    %c128 = arith.constant 128 : index
    %c0_13 = arith.constant 0 : index
    %12 = vector.load %arg5[%c0_12, %c128, %c0_13] : memref<1x384x128xbf16, #tpu.memory_space<vmem>>, vector<1x128x128xbf16>
    %13 = vector.shape_cast %12 : vector<1x128x128xbf16> to vector<128x128xbf16>
    %cst_14 = arith.constant dense<0.000000e+00> : vector<14x128xf32>
    %14 = tpu.matmul %11, %13, %cst_14 {dimension_numbers = #tpu.dot_dimension_numbers<[1], [0], [0], [1], [0, 0, 1, 1], [], []>} : vector<14x128xbf16>, vector<128x128xbf16>, vector<14x128xf32> -> vector<14x128xf32>
    %15 = arith.addf %9, %14 : vector<14x128xf32>
    %c0_15 = arith.constant 0 : index
    %c0_16 = arith.constant 0 : index
    %c2 = arith.constant 2 : index
    %c0_17 = arith.constant 0 : index
    %16 = vector.load %arg4[%c0_15, %c0_16, %c2, %c0_17] : memref<1x1x16x128xbf16, #tpu.memory_space<vmem>>, vector<1x1x14x128xbf16>
    %17 = vector.shape_cast %16 : vector<1x1x14x128xbf16> to vector<14x128xbf16>
    %c0_18 = arith.constant 0 : index
    %c256 = arith.constant 256 : index
    %c0_19 = arith.constant 0 : index
    %18 = vector.load %arg5[%c0_18, %c256, %c0_19] : memref<1x384x128xbf16, #tpu.memory_space<vmem>>, vector<1x128x128xbf16>
    %19 = vector.shape_cast %18 : vector<1x128x128xbf16> to vector<128x128xbf16>
    %cst_20 = arith.constant dense<0.000000e+00> : vector<14x128xf32>
    %20 = tpu.matmul %17, %19, %cst_20 {dimension_numbers = #tpu.dot_dimension_numbers<[1], [0], [0], [1], [0, 0, 1, 1], [], []>} : vector<14x128xbf16>, vector<128x128xbf16>, vector<14x128xf32> -> vector<14x128xf32>
    %21 = arith.addf %15, %20 : vector<14x128xf32>
    %c0_21 = arith.constant 0 : index
    %c0_22 = arith.constant 0 : index
    %22 = vector.load %arg9[%c0_21, %c0_22] : memref<14x128xf32, #tpu.memory_space<vmem>>, vector<14x128xf32>
    tpu.vector_store %arg9[%c0_21, %c0_22], %21 {strides = array<i32>} : memref<14x128xf32, #tpu.memory_space<vmem>>, vector<14x128xf32>,
    %c2_i32 = arith.constant 2 : i32
    %23 = arith.cmpi eq, %arg3, %c2_i32 : i32
    %24 = arith.extui %23 : i1 to i32
    %c0_i32_23 = arith.constant 0 : i32
    %25 = arith.cmpi ne, %24, %c0_i32_23 : i32
    scf.if %25 {
      %c0_24 = arith.constant 0 : index
      %c0_25 = arith.constant 0 : index
      %26 = vector.load %arg9[%c0_24, %c0_25] : memref<14x128xf32, #tpu.memory_space<vmem>>, vector<14x128xf32>
      %c0_26 = arith.constant 0 : index
      %c0_27 = arith.constant 0 : index
      %27 = vector.load %arg6[%c0_26, %c0_27] : memref<1x128xf32, #tpu.memory_space<vmem>>, vector<1x128xf32>
      %28 = vector.broadcast %27 : vector<1x128xf32> to vector<14x128xf32>
      %29 = arith.mulf %26, %28 : vector<14x128xf32>
      %c0_28 = arith.constant 0 : index
      %c0_29 = arith.constant 0 : index
      %30 = vector.load %arg7[%c0_28, %c0_29] : memref<1x128xf32, #tpu.memory_space<vmem>>, vector<1x128xf32>
      %31 = vector.broadcast %30 : vector<1x128xf32> to vector<14x128xf32>
      %32 = arith.addf %29, %31 : vector<14x128xf32>
      %cst_30 = arith.constant 0.000000e+00 : f32
      %33 = vector.broadcast %cst_30 : f32 to vector<14x128xf32>
      %34 = arith.maximumf %32, %33 : vector<14x128xf32>
      %35 = arith.truncf %34 : vector<14x128xf32> to vector<14x128xbf16>
      %c0_31 = arith.constant 0 : index
      %c0_32 = arith.constant 0 : index
      %c0_33 = arith.constant 0 : index
      %c0_34 = arith.constant 0 : index
      %36 = vector.load %arg8[%c0_31, %c0_32, %c0_33, %c0_34] : memref<1x1x14x128xbf16, #tpu.memory_space<vmem>>, vector<1x1x14x128xbf16>
      %37 = vector.shape_cast %36 : vector<1x1x14x128xbf16> to vector<14x128xbf16>
      %38 = vector.shape_cast %35 : vector<14x128xbf16> to vector<1x1x14x128xbf16>
      tpu.vector_store %arg8[%c0_31, %c0_32, %c0_33, %c0_34], %38 {strides = array<i32>} : memref<1x1x14x128xbf16, #tpu.memory_space<vmem>>, vector<1x1x14x128xbf16>,
    } else {
    }
    return
  }
  func.func @transform_0(%arg0: i32, %arg1: i32, %arg2: i32, %arg3: i32) -> (i32, i32, i32, i32) {
    %c1_i32 = arith.constant 1 : i32
    %0 = arith.muli %arg1, %c1_i32 : i32
    %1 = arith.addi %0, %arg3 : i32
    %c0_i32 = arith.constant 0 : i32
    %c0_i32_0 = arith.constant 0 : i32
    %c0_i32_1 = arith.constant 0 : i32
    return %arg0, %1, %c0_i32, %c0_i32_0 : i32, i32, i32, i32
  }
  func.func @transform_1(%arg0: i32, %arg1: i32, %arg2: i32, %arg3: i32) -> (i32, i32, i32) {
    %c0_i32 = arith.constant 0 : i32
    %c0_i32_0 = arith.constant 0 : i32
    return %arg3, %c0_i32, %arg2 : i32, i32, i32
  }
  func.func @transform_2(%arg0: i32, %arg1: i32, %arg2: i32, %arg3: i32) -> (i32, i32) {
    %c0_i32 = arith.constant 0 : i32
    %c0_i32_0 = arith.constant 0 : i32
    return %c0_i32, %arg2 : i32, i32
  }
  func.func @transform_3(%arg0: i32, %arg1: i32, %arg2: i32, %arg3: i32) -> (i32, i32) {
    %c0_i32 = arith.constant 0 : i32
    %c0_i32_0 = arith.constant 0 : i32
    return %c0_i32, %arg2 : i32, i32
  }
  func.func @transform_4(%arg0: i32, %arg1: i32, %arg2: i32, %arg3: i32) -> (i32, i32, i32, i32) {
    %c0_i32 = arith.constant 0 : i32
    %c0_i32_0 = arith.constant 0 : i32
    return %arg0, %arg1, %c0_i32, %arg2 : i32, i32, i32, i32
  }
}

</mosaic_0001>

<bundles_post_ra>
// kernel: tpu_custom_call.1
= control target key start
LH: loop header
LB: loop body
LE: loop exit
PB: predicated region body
PF: predicated region fallthrough
CT: control target
= control target key end

     0   :  { %s1789_s0 = inlined_call_operand.hbm [shape: bf16[2,16,16,128], index: 0, kind: input, shape index: {}]   ;;  %s1790_s1 = inlined_call_operand.hbm [shape: bf16[3,384,128], index: 1, kind: input, shape index: {}]   ;;  %s1791_s2 = inlined_call_operand.vmem [shape: f32[1,128], index: 2, kind: input, shape index: {}]   ;;  %s1792_s3 = inlined_call_operand.vmem [shape: f32[1,128], index: 3, kind: input, shape index: {}]   ;;  %s1793_s4 = inlined_call_operand.vmem [shape: bf16[2,14,14,128], index: 4, kind: output, shape index: {}]  }
   0x1   :  { %1805 = sst [smem:[#allocation16_spill]] %s1791_s2 }
   0x2   :  { %1806 = sst [smem:[#allocation17_spill]] %s1792_s3 }
   0x3   :  { %1807 = sst [smem:[#allocation18_spill]] %s1793_s4 }
   0x4   :  { %9 = vsyncpa [#allocation4], 0 }
   0x5   :  { %11 = vsyncpa [#allocation4 + $0x1], 0 }
   0x6   :  { %12 = vsyncpa [#allocation6], 0 }
   0x7   :  { %14 = vsyncpa [#allocation6 + $0x1], 0  ;;  %s1408_s15 = smov 0   ;;  %s1410_s16 = smov 0  }
   0x8   :  { %s1412_s17 = smov 0   ;;  %s1414_s18 = smov 0  }
   0x9   :  { %s1416_s19 = smov 0   ;;  %s1418_s20 = smov 0  }
   0xa   :  { %s1420_s21 = smov 0   ;;  %s1422_s22 = smov 0  }
   0xb   :  { %s1424_s23 = smov 0   ;;  %s1426_s24 = smov 0  }
   0xc   :  { %s1428_s25 = smov 0   ;;  %s1430_s26 = smov 0  }
   0xd   :  { %s1432_s27 = smov 0  }
   0xe LB: > { %1808 = sst [smem:[#allocation9_spill]] %s1350_s21  ;;  %s905_s28 = sadd.s32 4294967295, %s1374_s27   ;;  %s1374_s27 = sphi %s1432_s27, %s20_s27   ;;  %s1370_s26 = sphi %s1430_s26, %s1851_s26   ;;  %s1366_s25 = sphi %s1428_s25, %s1839_s25   ;;  %s1362_s24 = sphi %s1426_s24, %s1850_s24   ;;  %s1358_s23 = sphi %s1424_s23, %s1849_s23   ;;  %s1354_s22 = sphi %s1422_s22, %s1848_s22   ;;  %s1350_s21 = sphi %s1420_s21, %s1847_s21   ;;  %s1346_s20 = sphi %s1418_s20, %s1846_s20   ;;  %s1342_s19 = sphi %s1416_s19, %s1845_s19   ;;  %s1338_s18 = sphi %s1414_s18, %s1844_s18   ;;  %s1334_s17 = sphi %s1412_s17, %s1843_s17   ;;  %s1330_s16 = sphi %s1410_s16, %s1842_s16   ;;  %s1326_s15 = sphi %s1408_s15, %s1841_s15  }
   0xf   : > { %1809 = sst [smem:[#allocation10_spill]] %s1354_s22  ;;  %s35_s29 = sadd.s32 1, %s1362_s24 }
  0x10   : > { %1810 = sst [smem:[#allocation11_spill]] %s1358_s23  ;;  %p36_p0 = scmp.ge.s32.totalorder %s35_s29, 3 }
  0x11   : > { %1811 = sst [smem:[#allocation12_spill]] %s1366_s25  ;;  %s42_s30 = sadd.s32 1, %s1366_s25 }
  0x12   : > { %s46_s5 = sadd.s32 1, %s1370_s26  ;;  %s1479_s6 = sadd.s32 %s1362_s24, %s1366_s25 }
  0x13   : > { %s1853_s29 = smov (%p36_p0, %s35_s29), 0  ;;  %s1855_s30 = smov (!%p36_p0, %s42_s30), %s1366_s25 }
  0x14   : > { %1812 = sst [smem:[#allocation13_spill]] %s1853_s29  ;;  %s57_s7 = sadd.s32 1, %s1346_s20 }
  0x15   : > { %p64_p1 = scmp.ne.s32.totalorder %s1346_s20, %s1342_s19  ;;  %p44_p2 = scmp.ge.s32.totalorder %s1855_s30, 14 }
  0x16   : > { %p1801_p3 = scmp.eq.s32.totalorder %s1374_s27, 0  ;;  %p70_p4 = scmp.ne.s32.totalorder %s1342_s19, %s1338_s18 }
  0x17   : > { %p1490_p5 = scmp.eq.s32.totalorder %s905_s28, 0  ;;  %s1857_s30 = smov (%p44_p2, %s1855_s30), 0 }
  0x18   : > { %1814 = sst [smem:[#allocation14_spill]] %s1857_s30  ;;  %s1859_s5 = smov (!%p44_p2, %s46_s5), %s1370_s26 }
  0x19   : > { %s1813_s8 = scalar_select %p1490_p5, 1, 0 }
  0x1a   : > { %s51_s9 = sadd.s32 %s1857_s30, %s1853_s29  ;;  %p1501_p6 = por %p1801_p3, %p64_p1 }
  0x1b   : > { %p48_p7 = scmp.ge.s32.totalorder %s1859_s5, 2  ;;  %s53_s11 = ssub.s32 %s1479_s6, %s51_s9 }
  0x1c   : > { %p1508_p8 = por %p1490_p5, %p70_p4  ;;  %s80_s13 = ssub.s32 %s1362_s24, %s1853_s29 }
  0x1d   : > { %s1861_s5 = smov (%p48_p7, %s1859_s5), 0  ;;  %p1516_p9 = scmp.eq.s32.totalorder %s80_s13, 0 }
  0x1e   : > { %s1816_s12 = scalar_select %p1508_p8, 1, 0 }
  0x1f   : > { %1817 = sst [smem:[#allocation15_spill]] %s1861_s5  ;;  %s52_s18 = ssub.s32 %s1370_s26, %s1861_s5 }
  0x20   : > { %p1800_p10 = scmp.lt.s32.totalorder %s1374_s27, 84  ;;  %s54_s28 = sor.u32 %s53_s11, %s52_s18 }
  0x21   : > { %s216_s9 = sand.u32 1, %s1346_s20   ;;  %p55_p11 = scmp.eq.s32.totalorder %s54_s28, 0 }
  0x22   : > { %s911_s30 = sshll.u32 %s216_s9, 3  ;;  %s912_s25 = sshll.u32 %s1479_s6, 1 }
  0x23   : > { %s1526_s3 = scalar_select %p55_p11, %s1346_s20, %s57_s7  }
  0x24   : > { %s913_s29 = sshll.u32 %s1370_s26, 5  ;;  %s220_s21 = scalar_lea.vmem [#allocation3], %s911_s30 }
  0x25   : > { %s227_s2 = sadd.s32 %s913_s29, %s912_s25  ;;  %s230_s4 = sshll.u32 %s220_s21, 4  ;;  %s1529_s4 = int_to_ptr.vmem [resolvable:$true] %s230_s4 }
  0x26   : > { %s914_s13 = sshll.u32 %s227_s2, 6  ;;  %p1540_p12 = pnand %p1800_p10, %p1501_p6 }
  0x27   : > { %s1534_s5 = scalar_lea.hbm %s1789_s0, %s914_s13  ;;  %s1545_s2 = scalar_lea.sflag [#allocation4], %s216_s9 }
  0x28   : > { %s1204_s21 = scalar_lea.hbm %s1534_s5, 128  ;;  %p1206_p1 = pneg %p1540_p12 }
  0x29   : > { %p1205_p0 = scmp.ne.s32.totalorder %s1534_s5, %s1204_s21  ;;  %s1209_s25 = scalar_lea.hbm %s1789_s0, 4096 }
  0x2a   : > { %p1210_p6 = scmp.lt.u32.totalorder %s1534_s5, %s1789_s0  ;;  %p1211_p7 = scmp.lt.u32.totalorder %s1209_s25, %s1204_s21 }
  0x2b   : > { %p1207_p2 = pnand %p1206_p1, %p1205_p0  ;;  %p1213_p10 = scmp.lt.u32.totalorder %s1204_s21, %s1534_s5 }
  0x2c   : > { %p1212_p11 = por %p1211_p7, %p1210_p6 }
  0x2d   : > { %p1208_p4 = pneg %p1207_p2 }
  0x2e   : > { %p1214_p3 = por %p1213_p10, %p1212_p11 }
  0x30   : > { %p1215_p13 = pnand %p1214_p3, %p1208_p4 }
  0x32   : > { %1218 = shalt.err (!%p1215_p13)
}
  0x33   : > { %s1219_s7 = scalar_lea.vmem %s1529_s4, 128  ;;  %s1376_s10 = smov [#allocation3]  }
  0x34   : > { %p1220_p0 = scmp.ne.s32.totalorder %s1529_s4, %s1219_s7  ;;  %s1224_s11 = sshll.u32 %s1376_s10, 4  ;;  %s1225_s11 = int_to_ptr.vmem [resolvable:$false] %s1224_s11 }
  0x35   : > { %s1226_s18 = scalar_lea.vmem %s1225_s11, 256  ;;  %p1227_p5 = scmp.lt.s32.totalorder %s1529_s4, %s1225_s11 }
  0x36   : > { %p1222_p2 = pnand %p1220_p0, %p1206_p1  ;;  %p1228_p6 = scmp.lt.s32.totalorder %s1226_s18, %s1219_s7 }
  0x38   : > { %p1223_p8 = pneg %p1222_p2  ;;  %p1229_p7 = por %p1228_p6, %p1227_p5 }
  0x3a   : > { %p1230_p10 = pnand %p1229_p7, %p1223_p8 }
  0x3c   : > { %1233 = shalt.err (!%p1230_p10)
}
  0x3d   : > { %s1377_s28 = smov 64   ;;  %s1378_s9 = smov 4  }
  0x3e   : > { %1063 = dma.hbm_to_vmem [thread:$0]  (!%p1540_p12), %s1534_s5, 128, %s1529_s4, %s1545_s2, %s1377_s28, %s1377_s28, %s1378_s9  }
  0x3f   : > { %p260_p3 = scmp.lt.s32.totalorder %s1374_s27, 85  ;;  %p1820_p5 = scmp.ge.s32.totalorder %s1374_s27, 1 }
  0x40   : > { %s85_s21 = sadd.s32 1, %s1334_s17  ;;  %p92_p13 = scmp.ne.s32.totalorder %s1334_s17, %s1330_s16 }
  0x41   : > { %p1579_p8 = pnand %p1820_p5, %p260_p3  ;;  %p1822_p1 = scmp.eq.s32.totalorder %s1374_s27, 0 }
  0x42   : > { %s1589_s22 = scalar_select %p1516_p9, %s1334_s17, %s85_s21  }
  0x43   : > { %p94_p4 = por %p92_p13, %p1822_p1  ;;  %p98_p11 = scmp.ne.s32.totalorder %s1330_s16, %s1326_s15 }
  0x44   : > { %s240_s23 = sand.u32 1, %s1334_s17   ;;  %s1053_s6 = smul.u32 3072, %s1362_s24 }
  0x45   : > { %p1823_p0 = scmp.ne.s32.totalorder %s1813_s8, 0  ;;  %s1052_s4 = smul.u32 192, %s240_s23 }
  0x46   : > { %p1825_p12 = scmp.lt.s32.totalorder %s1374_s27, 84  ;;  %s1612_s29 = scalar_lea.hbm %s1790_s1, %s1053_s6 }
  0x47   : > { %p1599_p2 = por %p98_p11, %p1823_p0  ;;  %s244_s15 = scalar_lea.vmem [#allocation5], %s1052_s4 }
  0x48   : > { %p1605_p6 = pnand %p1825_p12, %p94_p4  ;;  %s252_s8 = sshll.u32 %s244_s15, 4  ;;  %s1614_s8 = int_to_ptr.vmem [resolvable:$true] %s252_s8 }
  0x49   : > { %s1824_s25 = scalar_select %p1599_p2, 1, 0 }
  0x4a   : > { %s1616_s30 = scalar_lea.sflag [#allocation6], %s240_s23  ;;  %s1234_s7 = scalar_lea.hbm %s1612_s29, 3072 }
  0x4b   : > { %p1235_p9 = scmp.ne.s32.totalorder %s1612_s29, %s1234_s7  ;;  %p1236_p7 = pneg %p1605_p6 }
  0x4c   : > { %s1239_s18 = scalar_lea.hbm %s1790_s1, 9216  ;;  %p1240_p5 = scmp.lt.u32.totalorder %s1612_s29, %s1790_s1 }
  0x4d   : > { %p1237_p10 = pnand %p1236_p7, %p1235_p9  ;;  %p1241_p13 = scmp.lt.u32.totalorder %s1239_s18, %s1234_s7 }
  0x4e   : > { %p1243_p4 = scmp.lt.u32.totalorder %s1234_s7, %s1612_s29 }
  0x4f   : > { %p1238_p3 = pneg %p1237_p10  ;;  %p1242_p1 = por %p1241_p13, %p1240_p5 }
  0x51   : > { %p1244_p11 = por %p1243_p4, %p1242_p1 }
  0x53   : > { %p1245_p0 = pnand %p1244_p11, %p1238_p3 }
  0x55   : > { %1248 = shalt.err (!%p1245_p0)
}
  0x56   : > { %s1249_s23 = scalar_lea.vmem %s1614_s8, 3072  ;;  %s1379_s4 = smov [#allocation5]  }
  0x57   : > { %p1250_p12 = scmp.ne.s32.totalorder %s1614_s8, %s1249_s23  ;;  %s1254_s2 = sshll.u32 %s1379_s4, 4  ;;  %s1255_s2 = int_to_ptr.vmem [resolvable:$false] %s1254_s2 }
  0x58   : > { %s1256_s14 = scalar_lea.vmem %s1255_s2, 6144  ;;  %p1257_p2 = scmp.lt.s32.totalorder %s1614_s8, %s1255_s2 }
  0x59   : > { %p1252_p9 = pnand %p1250_p12, %p1236_p7  ;;  %p1258_p5 = scmp.lt.s32.totalorder %s1256_s14, %s1249_s23 }
  0x5b   : > { %p1253_p10 = pneg %p1252_p9  ;;  %p1259_p13 = por %p1258_p5, %p1257_p2 }
  0x5d   : > { %p1260_p1 = pnand %p1259_p13, %p1253_p10 }
  0x5f   : > { %1263 = shalt.err (!%p1260_p1)
}
  0x60   : > { %1066 = dma.hbm_to_vmem [thread:$0]  (!%p1605_p6), %s1612_s29, 3072, %s1614_s8, %s1616_s30, %s1377_s28, %s1377_s28, %s1378_s9  }
  0x61   : > { %264 = sbr.rel (%p1579_p8) target bundleno = 425 (0x1a9), region = 36  ;;  %s266_s15 = sand.u32 (!%p1579_p8), 1, %s1342_s19  }
  0x62   : > { %s917_s7 = sshll.u32 (!%p1579_p8), %s266_s15, 3  ;;  %s267_s10 = scalar_lea.sflag (!%p1579_p8), [#allocation4], %s266_s15 }
  0x63   : > { %s1650_s11 = scalar_lea.vmem (!%p1579_p8), [#allocation3], %s917_s7  ;;  %p1827_p2 = scmp.ne.s32.totalorder (!%p1579_p8), %s1816_s12, 0 }
  0x68   : > { %1317 = dma.done.wait (%p1827_p2), %s267_s10, 128  }
  0x69   : > { %1319 = vsyncadd (%p1827_p2), %s267_s10, 4294967168  ;;  %s275_s5 = sand.u32 1, %s1330_s16   ;;  %p1828_p8 = scmp.ne.s32.totalorder %s1824_s25, 0 }
  0x6a   : > { %s1054_s18 = smul.u32 192, %s275_s5  ;;  %s276_s28 = scalar_lea.sflag [#allocation6], %s275_s5 }
  0x6c   : > { %s1657_s9 = scalar_lea.vmem [#allocation5], %s1054_s18 }
  0x6d   : > { %1321 = dma.done.wait (%p1828_p8), %s276_s28, 3072  }
  0x6e   : > { %1323 = vsyncadd (%p1828_p8), %s276_s28, 4294964224  ;;  %s1829_s13 = sld [smem:[#allocation11_spill]]  ;;  %s1830_s29 = sld [smem:[#allocation10_spill]] }
  0x6f   : > { %s1831_s4 = sld [smem:[#allocation18_spill]]  ;;  %s1832_s14 = sld [smem:[#allocation9_spill]] }
  0x74   : > { %p329_p6 = scmp.lt.s32.totalorder %s1829_s13, 1  ;;  %p331_p7 = scmp.lt.s32.totalorder %s1830_s29, 13 }
  0x75   : > { %p920_p3 = scmp.ne.s32.totalorder %s1832_s14, 0 }
  0x76   : > { %s1863_s13 = smov (!%p329_p6, %s1829_s13), 1  ;;  %s1865_s29 = smov (!%p331_p7, %s1830_s29), 13 }
  0x77   : > { %s1055_s12 = smul.u32 28, %s1863_s13  ;;  %s918_s8 = sshll.u32 %s1865_s29, 1  ;;  %v1380_v0 = vmov (!%p920_p3), 0.0  }
  0x78   : > { %345 = sbr.rel (%p920_p3) target bundleno = 127 (0x7f), region = 48  ;;  %346 = vst [vmem:[#allocation2] sm:$0xff] (!%p920_p3), %v1380_v0  ;;  %347 = vst [vmem:[#allocation2 + $0x8] sm:$0x3f] (!%p920_p3), %v1380_v0 }
  0x79   : > { %s338_s30 = sadd.s32 %s1055_s12, %s918_s8 }
  0x7a   : > { %s919_s21 = sshll.u32 %s338_s30, 2 }
  0x7b   : > { %s1670_s2 = scalar_lea.vmem %s1831_s4, %s919_s21 }
  0x7f PF: > { %v1177_v1 = vld [vmem:[%s1657_s9 + $0x40] sm:$0xff]   ;;  %v1381_v2 = vmov 0.0   ;;  %v1178_v3 = vld [vmem:[%s1657_s9 + $0x48] sm:$0xff]   ;;  %vm1382_vm0 = vmmov 0   ;;  %v1179_v4 = vld [vmem:[%s1657_s9 + $0x50] sm:$0xff]   ;;  %s1833_s25 = sld [smem:[#allocation9_spill]] }
  0x80   : > { %1004 = vmatprep.subr.bf16.mxu0 %v1381_v2  ;;  %984 = vmatprep.subr.bf16.mxu1 %v1381_v2  ;;  %v1184_v5 = vld [vmem:[%s1657_s9] sm:$0xff]   ;;  %v1186_v6 = vld [vmem:[%s1657_s9 + $0x8] sm:$0xff]   ;;  %v1180_v7 = vld [vmem:[%s1657_s9 + $0x58] sm:$0xff]  }
  0x81   : > { %1005 = vmatpush3.bf16.msra.mxu0 %v1177_v1  ;;  %1020 = vmatprep.mubr.msk.bf16.mxu0 %vm1382_vm0, %v1381_v2  ;;  %v1181_v8 = vld [vmem:[%s1657_s9 + $0x60] sm:$0xff]   ;;  %v350_v9 = vld [vmem:[%s1650_s11] sm:$0xf]  ;;  %v1692_v10 = vld [vmem:[%s1650_s11 + $0x4] sm:$0xf] }
  0x82   : > { %1006 = vmatprep.subr.bf16.mxu0 %v1381_v2  ;;  %1000 = vmatprep.mubr.msk.bf16.mxu1 %vm1382_vm0, %v1381_v2  ;;  %v1189_v11 = vld [vmem:[%s1657_s9 + $0x10] sm:$0xff]   ;;  %v930_v12 = vcombine.low %v350_v9, %v1692_v10  ;;  %v1191_v13 = vld [vmem:[%s1657_s9 + $0x18] sm:$0xff]   ;;  %v1182_v14 = vld [vmem:[%s1657_s9 + $0x68] sm:$0xff]  }
  0x83   : > { %985 = vmatpush3.bf16.msra.mxu1 %v1184_v5  ;;  %v1193_v16 = vld [vmem:[%s1657_s9 + $0x20] sm:$0xff]   ;;  %v1183_v17 = vld [vmem:[%s1657_s9 + $0x70] sm:$0xff]   ;;  %v1195_v20 = vld [vmem:[%s1657_s9 + $0x28] sm:$0xff]  }
  0x84   : > { %986 = vmatprep.subr.bf16.mxu1 %v1381_v2  ;;  %v488_v15 = vshll.u32 %v930_v12, 16  ;;  %v486_v18 = vshrl.u32 %v930_v12, 16  ;;  %v1185_v21 = vld [vmem:[%s1657_s9 + $0x78] sm:$0xff]   ;;  %v1197_v23 = vld [vmem:[%s1657_s9 + $0x30] sm:$0xff]   ;;  %v1188_v24 = vld [vmem:[%s1657_s9 + $0x80] sm:$0xff]  }
  0x85   : > { %1007 = vmatpush3.bf16.msra.mxu0 %v1178_v3  ;;  %v1199_v25 = vld [vmem:[%s1657_s9 + $0x38] sm:$0xff]   ;;  %v1190_v27 = vld [vmem:[%s1657_s9 + $0x88] sm:$0xff]   ;;  %v1192_v29 = vld [vmem:[%s1657_s9 + $0x90] sm:$0xff]   ;;  %p948_p4 = scmp.ne.s32.totalorder %s1833_s25, 2 }
  0x86   : > { %1008 = vmatprep.subr.bf16.mxu0 %v1381_v2  ;;  %v490_v19 = vrot.slane %v488_v15, 1  ;;  %v351_v26 = vld [vmem:[%s1650_s11 + $0x4] sm:$0x7]  ;;  %v1196_v31 = vld [vmem:[%s1657_s9 + $0xa0] sm:$0xff]   ;;  %v1198_v32 = vld [vmem:[%s1657_s9 + $0xa8] sm:$0xff]   ;;  %s1834_s10 = sld [smem:[#allocation16_spill]] (!%p948_p4) }
  0x87   : > { %987 = vmatpush3.bf16.msra.mxu1 %v1186_v6  ;;  %v921_v28 = vcombine.low %v350_v9, %v351_v26  ;;  %v1194_v30 = vld [vmem:[%s1657_s9 + $0x98] sm:$0xff]   ;;  %v1200_v33 = vld [vmem:[%s1657_s9 + $0xb0] sm:$0xff]   ;;  %v348_v42 = vld [vmem:[#allocation2] sm:$0xff]  ;;  %s1835_s18 = sld [smem:[#allocation17_spill]] (!%p948_p4) }
  0x88   : > { %988 = vmatprep.subr.bf16.mxu1 %v1381_v2  ;;  %v491_v22 = vor.u32 %v490_v19, %v486_v18  ;;  %v584_v34 = vld [vmem:[%s1650_s11] sm:$0xe]  ;;  %v349_v44 = vld [vmem:[#allocation2 + $0x8] sm:$0x3f] }
  0x89   : > { %1009 = vmatpush3.bf16.msra.mxu0 %v1179_v4  ;;  %v939_v35 = vcombine.low %v584_v34, %v1692_v10  ;;  %v1202_v36 = vld [vmem:[%s1657_s9 + $0xb8] sm:$0xff]  }
  0x8a   : > { %1010 = vmatprep.subr.bf16.mxu0 %v1381_v2 }
  0x8b   : > { %989 = vmatpush3.bf16.msra.mxu1 %v1189_v11  ;;  %v604_v37 = vrot.slane %v939_v35, 1 }
  0x8c   : > { %990 = vmatprep.subr.bf16.mxu1 %v1381_v2  ;;  %v949_v53 = vld [vmem:[%s1834_s10] ss:$0 sm:$0xff] (!%p948_p4) }
  0x8d   : > { %1011 = vmatpush3.bf16.msra.mxu0 %v1180_v7  ;;  %v950_v54 = vld [vmem:[%s1835_s18] ss:$0 sm:$0xff] (!%p948_p4) }
  0x8e   : > { %1012 = vmatprep.subr.bf16.mxu0 %v1381_v2 }
  0x8f   : > { %991 = vmatpush3.bf16.msra.mxu1 %v1191_v13 }
  0x90   : > { %992 = vmatprep.subr.bf16.mxu1 %v1381_v2 }
  0x91   : > { %1013 = vmatpush3.bf16.msra.mxu0 %v1181_v8 }
  0x92   : > { %1014 = vmatprep.subr.bf16.mxu0 %v1381_v2 }
  0x93   : > { %993 = vmatpush3.bf16.msra.mxu1 %v1193_v16 }
  0x94   : > { %994 = vmatprep.subr.bf16.mxu1 %v1381_v2 }
  0x95   : > { %1015 = vmatpush3.bf16.msra.mxu0 %v1182_v14 }
  0x96   : > { %1016 = vmatprep.subr.bf16.mxu0 %v1381_v2 }
  0x97   : > { %995 = vmatpush3.bf16.msra.mxu1 %v1195_v20 }
  0x98   : > { %996 = vmatprep.subr.bf16.mxu1 %v1381_v2 }
  0x99   : > { %1017 = vmatpush3.bf16.msra.mxu0 %v1183_v17 }
  0x9a   : > { %1018 = vmatprep.subr.bf16.mxu0 %v1381_v2 }
  0x9b   : > { %997 = vmatpush3.bf16.msra.mxu1 %v1197_v23 }
  0x9c   : > { %998 = vmatprep.subr.bf16.mxu1 %v1381_v2 }
  0x9d   : > { %1019 = vmatpush3.bf16.msra.mxu0 %v1185_v21 }
  0x9e   : > { %1024 = vmatprep.subr.bf16.mxu0 %v1381_v2 }
  0x9f   : > { %999 = vmatpush3.bf16.msra.mxu1 %v1199_v25 }
  0xa0   : > { %1021 = vmatmul.mubr.bf16.vlgmr.msra.gmra.mrb[0].mxu0 %v491_v22 }
  0xa1   : > { %1025 = vmatpush3.bf16.msra.mxu0 %v1188_v24  ;;  %1040 = vmatprep.mubr.msk.bf16.mxu0 %vm1382_vm0, %v1381_v2 }
  0xa2   : > { %1026 = vmatprep.subr.bf16.mxu0 %v1381_v2  ;;  %1001 = vmatmul.mubr.bf16.vlgmr.msra.gmra.mrb[0].mxu1 %v921_v28 }
  0xa5   : > { %1027 = vmatpush3.bf16.msra.mxu0 %v1190_v27 }
  0xa6   : > { %1028 = vmatprep.subr.bf16.mxu0 %v1381_v2 }
  0xa9   : > { %1029 = vmatpush3.bf16.msra.mxu0 %v1192_v29 }
  0xaa   : > { %1030 = vmatprep.subr.bf16.mxu0 %v1381_v2 }
  0xad   : > { %1031 = vmatpush3.bf16.msra.mxu0 %v1194_v30 }
  0xae   : > { %1032 = vmatprep.subr.bf16.mxu0 %v1381_v2 }
  0xb1   : > { %1033 = vmatpush3.bf16.msra.mxu0 %v1196_v31 }
  0xb2   : > { %1034 = vmatprep.subr.bf16.mxu0 %v1381_v2 }
  0xb5   : > { %1035 = vmatpush3.bf16.msra.mxu0 %v1198_v32 }
  0xb6   : > { %1036 = vmatprep.subr.bf16.mxu0 %v1381_v2 }
  0xb9   : > { %1037 = vmatpush3.bf16.msra.mxu0 %v1200_v33 }
  0xba   : > { %1038 = vmatprep.subr.bf16.mxu0 %v1381_v2 }
  0xbd   : > { %1039 = vmatpush3.bf16.msra.mxu0 %v1202_v36 }
  0xc0   : > { %1041 = vmatmul.mubr.bf16.vlgmr.msra.gmra.mrb[0].mxu0 %v604_v37 }
 0x175   : > { %v456_v38 = vpop.f32.mrb[0].mxu1 }
 0x176   : > { %v1002_v39 = vpop.f32.mrb[1].mxu1  ;;  %v463_v43 = vadd.f32 %v456_v38, %v348_v42 }
 0x177   : > { %v459_v40 = vpop.f32.mrb[2].mxu1 }
 0x178   : > { %v1003_v41 = vpop.f32.mrb[3].mxu1  ;;  %v464_v46 = vadd.f32 %v459_v40, %v349_v44 }
 0x192   : > { %702 = sbr.rel (%p948_p4) target bundleno = 425 (0x1a9), region = 52 }
 0x193   : > { %v688_v45 = vpop.f32.mrb[0].mxu0 }
 0x194   : > { %v1045_v47 = vadd.f32 %v688_v45, %v463_v43  ;;  %v1042_v48 = vpop.f32.mrb[1].mxu0 }
 0x195   : > { %v691_v49 = vpop.f32.mrb[2].mxu0 }
 0x196   : > { %697 = vst [vmem:[#allocation2] sm:$0xff] %v1045_v47  ;;  %v1047_v50 = vadd.f32 %v691_v49, %v464_v46  ;;  %v1043_v51 = vpop.f32.mrb[3].mxu0 }
 0x198   : > { %698 = vst [vmem:[#allocation2 + $0x8] sm:$0x3f] %v1047_v50 }
 0x19d   : > { %v703_v52 = vld [vmem:[#allocation2] sm:$0xff] }
 0x19e   : > { %v712_v55 = vmul.f32 %v949_v53, %v703_v52 }
 0x19f   : > { %v704_v56 = vld [vmem:[#allocation2 + $0x8] sm:$0x3f] }
 0x1a0   : > { %v713_v57 = vmul.f32 %v949_v53, %v704_v56  ;;  %v721_v58 = vadd.f32 %v950_v54, %v712_v55 }
 0x1a2   : > { %v722_v59 = vadd.f32 %v950_v54, %v713_v57  ;;  %v723_v60 = vmax.f32 %v721_v58, 0.0 }
 0x1a4   : > { %v724_v61 = vmax.f32 %v722_v59, 0.0  ;;  %v955_v62 = vpack.c.bf16 %v723_v60, %v723_v60 }
 0x1a6   : > { %v956_v63 = vpack.c.bf16 %v724_v61, %v724_v61  ;;  %733 = vst [vmem:[%s1670_s2] sm:$0xf] %v955_v62 }
 0x1a8   : > { %734 = vst [vmem:[%s1670_s2 + $0x4] sm:$0x7] %v956_v63 }
 0x1a9 PF: > { %s20_s27 = sadd.s32 1, %s1374_s27   ;;  %s1837_s9 = sld [smem:[#allocation12_spill]] }
 0x1aa   : > { %p1745_p11 = scmp.ge.s32.totalorder %s20_s27, 86   ;;  %s1838_s13 = sld [smem:[#allocation13_spill]] }
 0x1ab   : > { %s1839_s25 = sld [smem:[#allocation14_spill]]  ;;  %s1840_s29 = sld [smem:[#allocation15_spill]] }
 0x1ac   : > { %s1841_s15 = smov %s1330_s16  ;;  %s1842_s16 = smov %s1334_s17 }
 0x1ad   : > { %s1843_s17 = smov %s1589_s22  ;;  %s1844_s18 = smov %s1342_s19 }
 0x1ae   : > { %s1845_s19 = smov %s1346_s20  ;;  %s1846_s20 = smov %s1526_s3 }
 0x1af   : > { %s1847_s21 = smov %s1362_s24  ;;  %s1848_s22 = smov %s1837_s9 }
 0x1b0   : > { %s1849_s23 = smov %s1370_s26  ;;  %s1850_s24 = smov %s1838_s13 }
 0x1b1   : > { %s1851_s26 = smov %s1840_s29  ;;  %19 = sbr.rel (!%p1745_p11) target bundleno = 14 (0xe), region = 103 }
 0x1b8   :  { %770 = vsyncpa [#allocation4], 1 }
 0x1b9   :  { %772 = vsyncpa [#allocation4 + $0x1], 1 }
 0x1ba   :  { %773 = vsyncpa [#allocation6], 1 }
 0x1bb   :  { %775 = vsyncpa [#allocation6 + $0x1], 1 }

</bundles_post_ra>
